<compile_context>
chip_gen: v7x
topology: tpu7x:2x2x1
jax: 0.10.0
libtpu: 0.0.40
codegen_flags: <defaults>
</compile_context>

<pallas_src>
import jax
import jax.numpy as jnp
from jax.experimental import pallas as pl
from jax.experimental.pallas import tpu as pltpu

_LANE = 128
_SUB = 8
_MAX_BLOCK_ROWS = 2048          # (2048,128) f32 block = 1 MiB; 2 inputs x 2 buffers = 4 MiB VMEM
_MIN_BLOCKS_FOR_CORE_SPLIT = 8  # only split across cores when there is enough work


def _round_up(x: int, m: int) -> int:
    return (x + m - 1) // m * m


def _make_mape_sum_kernel(eps: float, rows_total: int, block_rows: int,
                          blocks_per_chunk: int):
    def kernel(p_ref, t_ref, o_ref):
        c = pl.program_id(0)   # chunk (parallel)
        i = pl.program_id(1)   # block within chunk (sequential reduction)

        @pl.when(i == 0)
        def _():
            o_ref[...] = jnp.zeros_like(o_ref)

        p = p_ref[...].astype(jnp.float32)
        t = t_ref[...].astype(jnp.float32)

        denom = jnp.float32(eps) + jnp.abs(t)
        # EUP approx reciprocal + one Newton-Raphson step (VPU muls) instead of fp32 divide.
        r = pl.reciprocal(denom, approx=True)
        r = r * (jnp.float32(2.0) - denom * r)
        contrib = jnp.abs(p - t) * r

        # Mask rows past the end of the input (ragged last block / clamped chunk blocks).
        row0 = (c * blocks_per_chunk + i) * block_rows
        row_ids = row0 + jax.lax.broadcasted_iota(jnp.int32, contrib.shape, 0)
        contrib = jnp.where(row_ids < rows_total, contrib, jnp.float32(0.0))

        # Fold (block_rows, 128) -> (8, 128) with plain vreg adds and accumulate into
        # the resident output block (written back to HBM once per chunk).
        folded = contrib.reshape(block_rows // _SUB, _SUB, _LANE).sum(axis=0)
        o_ref[...] += folded[None, :, :]

    return kernel


def mape_pallas(y_pred, y_true, eps: float = 1e-9):
    """Equivalent of ((y_pred - y_true).abs() / (eps + y_true.abs())).mean()."""
    assert y_pred.shape == y_true.shape
    total = int(y_pred.size)
    if total == 0:
        return jnp.float32(jnp.nan)

    p = y_pred.reshape(-1)
    t = y_true.reshape(-1)

    aligned = (total // _LANE) * _LANE
    tail = total - aligned

    partial = jnp.float32(0.0)

    if aligned > 0:
        rows = aligned // _LANE
        if aligned == total:
            p2 = p.reshape(rows, _LANE)
            t2 = t.reshape(rows, _LANE)
        else:
            p2 = p[:aligned].reshape(rows, _LANE)
            t2 = t[:aligned].reshape(rows, _LANE)

        block_rows = min(_MAX_BLOCK_ROWS, _round_up(rows, _SUB))
        blocks_total = pl.cdiv(rows, block_rows)
        n_chunks = 2 if blocks_total >= _MIN_BLOCKS_FOR_CORE_SPLIT else 1
        bpc = pl.cdiv(blocks_total, n_chunks)

        if bpc * n_chunks != blocks_total:
            # Clamp so no block index is fully out of bounds; in-kernel row mask
            # zeroes the duplicated data.
            def in_map(c, i):
                return (jnp.minimum(c * bpc + i, blocks_total - 1), 0)
        else:
            def in_map(c, i):
                return (c * bpc + i, 0)

        kernel = _make_mape_sum_kernel(eps, rows, block_rows, bpc)

        out = pl.pallas_call(
            kernel,
            out_shape=jax.ShapeDtypeStruct((n_chunks, _SUB, _LANE), jnp.float32),
            grid_spec=pltpu.PrefetchScalarGridSpec(
                num_scalar_prefetch=0,
                grid=(n_chunks, bpc),
                in_specs=[
                    pl.BlockSpec((block_rows, _LANE), in_map),
                    pl.BlockSpec((block_rows, _LANE), in_map),
                ],
                out_specs=pl.BlockSpec((1, _SUB, _LANE), lambda c, i: (c, 0, 0)),
            ),
            compiler_params=pltpu.CompilerParams(
                dimension_semantics=("parallel", "arbitrary"),
                vmem_limit_bytes=32 * 1024 * 1024,
            ),
        )(p2, t2)
        partial = partial + jnp.sum(out)

    if tail > 0:
        # <128 leftover elements: negligible, handled in plain JAX.
        p_t = p[aligned:].astype(jnp.float32)
        t_t = t[aligned:].astype(jnp.float32)
        partial = partial + jnp.sum(jnp.abs(p_t - t_t) / (jnp.float32(eps) + jnp.abs(t_t)))

    return partial / jnp.float32(total)


def mape_ref(y_pred, y_true, eps: float = 1e-9):
    return jnp.mean(jnp.abs(y_pred - y_true) / (eps + jnp.abs(y_true)))


if __name__ == "__main__":
    key = jax.random.PRNGKey(0)
    k1, k2 = jax.random.split(key)
    shape = (2, 4, 16, 16)  # NCHW-style input; kernel is layout-agnostic (flattened)
    y_pred = jax.random.normal(k1, shape, dtype=jnp.float32)
    y_true = jax.random.normal(k2, shape, dtype=jnp.float32)

    out = jax.block_until_ready(mape_pallas(y_pred, y_true))
    ref = mape_ref(y_pred, y_true)
    assert jnp.allclose(out, ref, rtol=2e-5, atol=1e-6), (out, ref)
    print("KERNEL_OK")
</pallas_src>

<mosaic_0001>
module attributes {stable_mosaic.version = 11 : i64} {
  func.func @kernel(%arg0: i32, %arg1: i32, %arg2: memref<16x128xf32, #tpu.memory_space<vmem>>, %arg3: memref<16x128xf32, #tpu.memory_space<vmem>>, %arg4: memref<1x8x128xf32, #tpu.memory_space<vmem>>) attributes {dimension_semantics = [#tpu.dimension_semantics<parallel>, #tpu.dimension_semantics<arbitrary>], iteration_bounds = array<i64: 1, 1>, scalar_prefetch = 0 : i64, scratch_operands = 0 : i64, tpu.core_type = #tpu.core_type<tc>, window_params = [{transform_indices = @transform_0, window_bounds = array<i64: 16, 128>}, {transform_indices = @transform_1, window_bounds = array<i64: 16, 128>}, {transform_indices = @transform_2, window_bounds = array<i64: 1, 8, 128>}]} {
    %c0_i32 = arith.constant 0 : i32
    %0 = arith.cmpi eq, %arg1, %c0_i32 : i32
    %1 = arith.extui %0 : i1 to i32
    %c0_i32_0 = arith.constant 0 : i32
    %2 = arith.cmpi ne, %1, %c0_i32_0 : i32
    scf.if %2 {
      %cst_14 = arith.constant 0.000000e+00 : f32
      %32 = vector.broadcast %cst_14 : f32 to vector<1x8x128xf32>
      %c0_15 = arith.constant 0 : index
      %c0_16 = arith.constant 0 : index
      %c0_17 = arith.constant 0 : index
      %33 = vector.load %arg4[%c0_15, %c0_16, %c0_17] : memref<1x8x128xf32, #tpu.memory_space<vmem>>, vector<1x8x128xf32>
      tpu.vector_store %arg4[%c0_15, %c0_16, %c0_17], %32 {strides = array<i32>} : memref<1x8x128xf32, #tpu.memory_space<vmem>>, vector<1x8x128xf32>,
    } else {
    }
    %c0 = arith.constant 0 : index
    %c0_1 = arith.constant 0 : index
    %3 = vector.load %arg2[%c0, %c0_1] : memref<16x128xf32, #tpu.memory_space<vmem>>, vector<16x128xf32>
    %c0_2 = arith.constant 0 : index
    %c0_3 = arith.constant 0 : index
    %4 = vector.load %arg3[%c0_2, %c0_3] : memref<16x128xf32, #tpu.memory_space<vmem>>, vector<16x128xf32>
    %5 = math.absf %4 : vector<16x128xf32>
    %cst = arith.constant 9.99999971E-10 : f32
    %6 = vector.broadcast %cst : f32 to vector<16x128xf32>
    %7 = arith.addf %6, %5 : vector<16x128xf32>
    %8 = tpu.reciprocal %7 {approx = true} : vector<16x128xf32> -> vector<16x128xf32>
    %9 = arith.mulf %7, %8 : vector<16x128xf32>
    %cst_4 = arith.constant 2.000000e+00 : f32
    %10 = vector.broadcast %cst_4 : f32 to vector<16x128xf32>
    %11 = arith.subf %10, %9 : vector<16x128xf32>
    %12 = arith.mulf %8, %11 : vector<16x128xf32>
    %13 = arith.subf %3, %4 : vector<16x128xf32>
    %14 = math.absf %13 : vector<16x128xf32>
    %15 = arith.mulf %14, %12 : vector<16x128xf32>
    %c1_i32 = arith.constant 1 : i32
    %16 = arith.muli %arg0, %c1_i32 : i32
    %17 = arith.addi %16, %arg1 : i32
    %c16_i32 = arith.constant 16 : i32
    %18 = arith.muli %17, %c16_i32 : i32
    %19 = tpu.iota {dimensions = array<i32: 0>} : vector<16x128xi32>
    %20 = vector.broadcast %18 : i32 to vector<16x128xi32>
    %21 = arith.addi %20, %19 : vector<16x128xi32>
    %c16_i32_5 = arith.constant 16 : i32
    %22 = vector.broadcast %c16_i32_5 : i32 to vector<16x128xi32>
    %23 = arith.cmpi slt, %21, %22 : vector<16x128xi32>
    %cst_6 = arith.constant 0.000000e+00 : f32
    %24 = vector.broadcast %cst_6 : f32 to vector<16x128xf32>
    %25 = arith.select %23, %15, %24 : vector<16x128xi1>, vector<16x128xf32>
    %26 = vector.shape_cast %25 : vector<16x128xf32> to vector<2x8x128xf32>
    %cst_7 = arith.constant dense<0.000000e+00> : vector<8x128xf32>
    %27 = vector.multi_reduction <add>, %26, %cst_7 [0] : vector<2x8x128xf32> to vector<8x128xf32>
    %c0_8 = arith.constant 0 : index
    %c0_9 = arith.constant 0 : index
    %c0_10 = arith.constant 0 : index
    %28 = vector.load %arg4[%c0_8, %c0_9, %c0_10] : memref<1x8x128xf32, #tpu.memory_space<vmem>>, vector<1x8x128xf32>
    %29 = vector.shape_cast %27 : vector<8x128xf32> to vector<1x8x128xf32>
    %30 = arith.addf %28, %29 : vector<1x8x128xf32>
    %c0_11 = arith.constant 0 : index
    %c0_12 = arith.constant 0 : index
    %c0_13 = arith.constant 0 : index
    %31 = vector.load %arg4[%c0_11, %c0_12, %c0_13] : memref<1x8x128xf32, #tpu.memory_space<vmem>>, vector<1x8x128xf32>
    tpu.vector_store %arg4[%c0_11, %c0_12, %c0_13], %30 {strides = array<i32>} : memref<1x8x128xf32, #tpu.memory_space<vmem>>, vector<1x8x128xf32>,
    return
  }
  func.func @transform_0(%arg0: i32, %arg1: i32) -> (i32, i32) {
    %c1_i32 = arith.constant 1 : i32
    %0 = arith.muli %arg0, %c1_i32 : i32
    %1 = arith.addi %0, %arg1 : i32
    %c0_i32 = arith.constant 0 : i32
    %c0_i32_0 = arith.constant 0 : i32
    return %1, %c0_i32 : i32, i32
  }
  func.func @transform_1(%arg0: i32, %arg1: i32) -> (i32, i32) {
    %c1_i32 = arith.constant 1 : i32
    %0 = arith.muli %arg0, %c1_i32 : i32
    %1 = arith.addi %0, %arg1 : i32
    %c0_i32 = arith.constant 0 : i32
    %c0_i32_0 = arith.constant 0 : i32
    return %1, %c0_i32 : i32, i32
  }
  func.func @transform_2(%arg0: i32, %arg1: i32) -> (i32, i32, i32) {
    %c0_i32 = arith.constant 0 : i32
    %c0_i32_0 = arith.constant 0 : i32
    %c0_i32_1 = arith.constant 0 : i32
    return %arg0, %c0_i32, %c0_i32_0 : i32, i32, i32
  }
}

</mosaic_0001>

<bundles_post_ra>
// kernel: tpu_custom_call.1
= control target key start
LH: loop header
LB: loop body
LE: loop exit
PB: predicated region body
PF: predicated region fallthrough
CT: control target
= control target key end

     0   :  { %7 = vsyncpa [#allocation3], 0  ;;  %s249_s0 = inlined_call_operand.hbm [shape: f32[16,128], index: 0, kind: input, shape index: {}]   ;;  %s250_s1 = inlined_call_operand.hbm [shape: f32[16,128], index: 1, kind: input, shape index: {}]   ;;  %s251_s2 = inlined_call_operand.hbm [shape: f32[1,8,128], index: 2, kind: output, shape index: {}]  }
   0x1   :  { %8 = vsyncpa [#allocation6], 0 }
   0x2   :  { %9 = vsyncpa [#allocation4], 0  ;;  %s193_s9 = smov [#allocation2]   ;;  %s121_s13 = scalar_lea.hbm %s249_s0, 256 }
   0x3   :  { %s19_s10 = sshll.u32 %s193_s9, 4  ;;  %p122_p0 = scmp.ne.s32.totalorder %s249_s0, %s121_s13  ;;  %s20_s10 = int_to_ptr.vmem [resolvable:$true] %s19_s10 }
   0x4   :  { %p125_p1 = scmp.lt.u32.totalorder %s121_s13, %s249_s0 }
   0x6   :  { %p127_p2 = pnand %p125_p1, %p122_p0 }
   0x8   :  { %130 = shalt.err (!%p127_p2)
}
   0x9   :  { %s131_s18 = scalar_lea.vmem %s20_s10, 256  ;;  %p136_p4 = scmp.lt.s32.totalorder %s20_s10, %s20_s10 }
   0xa   :  { %p132_p3 = scmp.ne.s32.totalorder %s20_s10, %s131_s18  ;;  %p137_p5 = scmp.lt.s32.totalorder %s131_s18, %s131_s18 }
   0xc   :  { %p138_p6 = por %p137_p5, %p136_p4 }
   0xe   :  { %p139_p7 = pnand %p138_p6, %p132_p3 }
  0x10   :  { %142 = shalt.err (!%p139_p7)
}
  0x11   :  { %s194_s19 = smov 128   ;;  %s195_s20 = smov 8  }
  0x12   :  { %25 = dma.hbm_to_vmem [thread:$0]  %s249_s0, 256, %s20_s10, [#allocation3], %s194_s19, %s194_s19, %s195_s20  }
  0x13   :  { %s196_s23 = smov [#allocation5]   ;;  %s143_s27 = scalar_lea.hbm %s250_s1, 256 }
  0x14   :  { %s35_s24 = sshll.u32 %s196_s23, 4  ;;  %p144_p8 = scmp.ne.s32.totalorder %s250_s1, %s143_s27  ;;  %s36_s24 = int_to_ptr.vmem [resolvable:$true] %s35_s24 }
  0x15   :  { %p147_p9 = scmp.lt.u32.totalorder %s143_s27, %s250_s1 }
  0x17   :  { %p149_p10 = pnand %p147_p9, %p144_p8 }
  0x19   :  { %152 = shalt.err (!%p149_p10)
}
  0x1a   :  { %s153_s4 = scalar_lea.vmem %s36_s24, 256  ;;  %p158_p12 = scmp.lt.s32.totalorder %s36_s24, %s36_s24 }
  0x1b   :  { %p154_p11 = scmp.ne.s32.totalorder %s36_s24, %s153_s4  ;;  %p159_p13 = scmp.lt.s32.totalorder %s153_s4, %s153_s4 }
  0x1d   :  { %p160_p0 = por %p159_p13, %p158_p12 }
  0x1f   :  { %p161_p1 = pnand %p160_p0, %p154_p11 }
  0x21   :  { %164 = shalt.err (!%p161_p1)
}
  0x22   :  { %41 = dma.hbm_to_vmem [thread:$0]  %s250_s1, 256, %s36_s24, [#allocation6], %s194_s19, %s194_s19, %s195_s20  }
  0x23   :  { %187 = dma.done.wait [#allocation3], 256  }
  0x24   :  { %188 = vsyncadd [#allocation3], 4294967040 }
  0x25   :  { %189 = dma.done.wait [#allocation6], 256  }
  0x26   :  { %190 = vsyncadd [#allocation6], 4294967040  ;;  %v59_v0 = vld [vmem:[#allocation5] sm:$0xff]  ;;  %v60_v1 = vld [vmem:[#allocation5 + $0x8] sm:$0xff]  ;;  %s197_s1 = smov [#allocation7]  }
  0x27   :  { %v61_v2 = vand.u32 2147483647, %v59_v0  ;;  %v62_v3 = vand.u32 2147483647, %v60_v1  ;;  %v57_v6 = vld [vmem:[#allocation2] sm:$0xff]  ;;  %v58_v7 = vld [vmem:[#allocation2 + $0x8] sm:$0xff] }
  0x28   :  { %v73_v8 = vsub.f32 %v57_v6, %v59_v0  ;;  %v74_v10 = vsub.f32 %v58_v7, %v60_v1  ;;  %s101_s6 = sshll.u32 %s197_s1, 4  ;;  %s102_s6 = int_to_ptr.vmem [resolvable:$true] %s101_s6 }
  0x29   :  { %v63_v4 = vadd.f32 1e-09, %v61_v2  ;;  %v64_v5 = vadd.f32 1e-09, %v62_v3  ;;  %s165_s7 = scalar_lea.vmem %s102_s6, 128  ;;  %p170_p3 = scmp.lt.s32.totalorder %s102_s6, %s102_s6 }
  0x2a   :  { %v75_v15 = vand.u32 2147483647, %v73_v8  ;;  %v76_v17 = vand.u32 2147483647, %v74_v10  ;;  %p166_p2 = scmp.ne.s32.totalorder %s102_s6, %s165_s7  ;;  %p171_p4 = scmp.lt.s32.totalorder %s165_s7, %s165_s7 }
  0x2b   :  { %117 = vrcp.f32 %v63_v4 }
  0x2c   :  { %119 = vrcp.f32 %v64_v5  ;;  %p172_p5 = por %p171_p4, %p170_p3 }
  0x2e   :  { %p173_p6 = pnand %p172_p5, %p166_p2 }
  0x35   :  { %v118_v9 = vpop.eup %117 }
  0x36   :  { %v120_v11 = vpop.eup %119  ;;  %v67_v12 = vmul.f32 %v118_v9, %v63_v4 }
  0x37   :  { %v68_v13 = vmul.f32 %v120_v11, %v64_v5 }
  0x38   :  { %v69_v14 = vsub.f32 2.0, %v67_v12 }
  0x39   :  { %v70_v16 = vsub.f32 2.0, %v68_v13 }
  0x3a   :  { %v71_v18 = vmul.f32 %v118_v9, %v69_v14 }
  0x3b   :  { %v72_v19 = vmul.f32 %v120_v11, %v70_v16 }
  0x3c   :  { %v77_v20 = vmul.f32 %v75_v15, %v71_v18 }
  0x3d   :  { %v78_v21 = vmul.f32 %v76_v17, %v72_v19 }
  0x3f   :  { %v91_v22 = vadd.f32 %v78_v21, %v77_v20 }
  0x41   :  { %94 = vst [vmem:[#allocation7] sm:$0xff] %v91_v22 }
  0x42   :  { %176 = shalt.err (!%p173_p6)
}
  0x43   :  { %s177_s10 = scalar_lea.hbm %s251_s2, 128 }
  0x44   :  { %p178_p7 = scmp.ne.s32.totalorder %s251_s2, %s177_s10  ;;  %p181_p8 = scmp.lt.u32.totalorder %s177_s10, %s251_s2 }
  0x46   :  { %p183_p9 = pnand %p181_p8, %p178_p7 }
  0x48   :  { %186 = shalt.err (!%p183_p9)
}
  0x49   :  { %104 = dma.vmem_to_hbm [thread:$0]  %s102_s6, 128, %s251_s2, [#allocation4]  }
  0x4a   :  { %191 = dma.done.wait [#allocation4], 128  }
  0x4b   :  { %192 = vsyncadd [#allocation4], 4294967168 }
  0x4c   :  { %108 = vsyncpa [#allocation3], 1 }
  0x4d   :  { %109 = vsyncpa [#allocation6], 1 }
  0x4e   :  { %110 = vsyncpa [#allocation4], 1 }

</bundles_post_ra>
